<compile_context>
chip_gen: v5e
topology: v5e:2x2
jax: 0.10.0
libtpu: 0.0.40
codegen_flags: <defaults>
</compile_context>

<pallas_src>
import functools

import jax
import jax.numpy as jnp
from jax.experimental import pallas as pl
from jax.experimental.pallas import tpu as pltpu


def _tpu_generation_config():
    """(target block bytes, vmem_limit cap, #TensorCores) per TPU generation."""
    kind = ""
    try:
        kind = jax.devices()[0].device_kind.lower()
    except Exception:
        pass
    if ("v5 lite" in kind) or ("v5e" in kind) or ("v5lite" in kind):
        # ~0.8 TB/s HBM: 4-8 MiB blocks already <10% step overhead; don't waste VMEM.
        return 6 * 1024 * 1024, 96 * 1024 * 1024, 1
    if ("v7" in kind) or ("7x" in kind):
        # ~3.2 TB/s HBM but 64 MiB VMEM/TC and 2 TCs: big blocks, modest cap, split rows.
        return 12 * 1024 * 1024, 48 * 1024 * 1024, 2
    # v6e (and sensible default for unknown parts): 128 MiB VMEM, ~1.4 TB/s HBM.
    return 16 * 1024 * 1024, 96 * 1024 * 1024, 1


def _round_up(v, m):
    return ((v + m - 1) // m) * m


def _gap_kernel(*refs, use_seg, groups, inner, inv_hw):
    # use_seg:  x_ref (TR, CK), seg_ref (CK, groups), o_ref (TR, groups), acc_ref (TR, groups) f32
    # else:     x_ref (TR, CK),                       o_ref (TR, groups), acc_ref (TR, groups) f32
    if use_seg:
        x_ref, seg_ref, o_ref, acc_ref = refs
    else:
        x_ref, o_ref, acc_ref = refs

    k = pl.program_id(1)

    @pl.when(k == 0)
    def _init():
        acc_ref[...] = jnp.zeros_like(acc_ref)

    x = x_ref[...]
    if use_seg:
        # Segmented row-sum on the MXU (idle otherwise): avoids the cross-lane XLU reduce and
        # the in-kernel reshape relayout of the folded-channel path.
        part = jnp.dot(x, seg_ref[...], preferred_element_type=jnp.float32)
    elif groups == 1:
        part = jnp.sum(x, axis=-1, keepdims=True, dtype=jnp.float32)
    else:
        # Non-float fallback only.
        part = jnp.sum(x.reshape(x.shape[0], groups, inner), axis=-1, dtype=jnp.float32)
    acc_ref[...] += part

    @pl.when(k == pl.num_programs(1) - 1)
    def _finish():
        o_ref[...] = (acc_ref[...] * inv_hw).astype(o_ref.dtype)


def global_avg_pool2d(x, *, target_block_bytes=None):
    """Global average pooling over spatial dims of an NCHW tensor -> (N, C, 1, 1)."""
    N, C, H, W = x.shape
    HW = H * W
    R = N * C
    itemsize = jnp.dtype(x.dtype).itemsize
    sub = 8 if itemsize >= 4 else (16 if itemsize == 2 else 32)

    blk_bytes, vmem_cap, n_cores = _tpu_generation_config()
    if target_block_bytes is None:
        target_block_bytes = blk_bytes

    # ---- fold channels into the lane axis when H*W is not lane friendly --------
    g = 1
    if HW % 128 != 0:
        for cand in range(2, R + 1):
            if R % cand == 0 and (cand * HW) % 128 == 0:
                g = cand
                break
        # Guard: if even `sub` folded rows would blow the block budget, fall back.
        if sub * g * HW * itemsize > target_block_bytes:
            g = 1

    RO = R // g          # rows after folding
    L = g * HW           # lanes per row
    xf = x.reshape(RO, L)

    # ---- lane (reduction) chunking for very large spatial extents --------------
    nk, ck = 1, L
    if g == 1 and L % 128 == 0 and sub * L * itemsize > target_block_bytes:
        max_ck = max(128, (target_block_bytes // (sub * itemsize)) // 128 * 128)
        best, d = 128, 128
        while d <= min(L, max_ck):
            if L % d == 0:
                best = d
            d += 128
        ck = best
        nk = L // ck

    # ---- row tiling -------------------------------------------------------------
    chunk_row_bytes = ck * itemsize
    tr_cap = max(1, target_block_bytes // chunk_row_bytes)
    if tr_cap >= RO:
        tr = RO
    else:
        tr = min(RO, max(sub, (tr_cap // sub) * sub))
    if n_cores >= 2:
        # Keep >= 2 row tiles (when the shape allows) so the "parallel" row axis can shard
        # across both TensorCores on v7x; also halves per-TC VMEM pressure.
        half = _round_up(pl.cdiv(RO, 2), sub)
        tr = min(tr, max(sub, half))
        tr = min(tr, RO)
    n_row = pl.cdiv(RO, tr)

    # ---- reduction operand: ones / block-diagonal segment matrix for the MXU ---
    is_float = jnp.issubdtype(x.dtype, jnp.floating)
    use_seg = bool(is_float and ((g > 1) or (ck % 128 == 0 and ck <= 512)))
    seg = None
    if use_seg:
        if g > 1:
            seg = (jnp.arange(L)[:, None] // HW == jnp.arange(g)[None, :]).astype(x.dtype)
        else:
            seg = jnp.ones((ck, 1), x.dtype)

    # ---- VMEM budget: double-buffered in/out + f32 accumulator (+ seg matrix) ---
    lane_out = _round_up(g, 128)
    vmem_needed = (2 * tr * _round_up(ck, 128) * itemsize
                   + 2 * tr * lane_out * itemsize
                   + tr * lane_out * 4)
    if use_seg:
        vmem_needed += 2 * _round_up(seg.shape[0], sub) * _round_up(seg.shape[1], 128) * itemsize
    vmem_limit = int(min(vmem_cap, max(int(vmem_needed * 1.5), 32 * 1024 * 1024)))
    if vmem_limit < vmem_needed + (2 << 20):       # pathological shapes: keep headroom
        vmem_limit = int(vmem_needed + (2 << 20))

    kernel = functools.partial(
        _gap_kernel,
        use_seg=use_seg,
        groups=g,
        inner=(HW if g > 1 else ck),
        inv_hw=1.0 / float(HW),
    )

    in_arrays = [xf]
    in_specs = [pl.BlockSpec((tr, ck), lambda i, k: (i, k))]
    if use_seg:
        in_arrays.append(seg)
        in_specs.append(pl.BlockSpec(seg.shape, lambda i, k: (0, 0)))

    cost = pl.CostEstimate(
        flops=2 * R * HW,
        transcendentals=0,
        bytes_accessed=R * HW * itemsize + R * itemsize,
    )

    out = pl.pallas_call(
        kernel,
        out_shape=jax.ShapeDtypeStruct((RO, g), x.dtype),
        grid=(n_row, nk),
        in_specs=in_specs,
        out_specs=pl.BlockSpec((tr, g), lambda i, k: (i, 0)),
        scratch_shapes=[pltpu.VMEM((tr, g), jnp.float32)],
        compiler_params=pltpu.CompilerParams(
            dimension_semantics=("parallel", "arbitrary"),
            vmem_limit_bytes=vmem_limit,
        ),
        cost_estimate=cost,
    )(*in_arrays)

    return out.reshape(N, C, 1, 1)


if __name__ == "__main__":
    key = jax.random.PRNGKey(0)
    k0, k1, k2 = jax.random.split(key, 3)

    # Main case: lane-aligned spatial extent (16x16 = 256 lanes) -> MXU ones-vector reduce.
    x = jax.random.normal(k0, (2, 4, 16, 16), dtype=jnp.float32)
    y = jax.block_until_ready(global_avg_pool2d(x))
    y_ref = jnp.mean(x, axis=(2, 3), keepdims=True)
    assert y.shape == (2, 4, 1, 1), y.shape
    assert jnp.allclose(y, y_ref, atol=1e-5, rtol=1e-5)

    # Non-lane-aligned spatial extent (7x7) with no usable channel fold -> masked-lane sum path.
    x2 = jax.random.normal(k1, (2, 4, 7, 7), dtype=jnp.float32)
    y2 = jax.block_until_ready(global_avg_pool2d(x2))
    assert jnp.allclose(y2, jnp.mean(x2, axis=(2, 3), keepdims=True), atol=1e-5, rtol=1e-5)

    # CNN-tail shape (7x7 with enough channels): folded-channel + block-diagonal MXU reduce path.
    x3 = jax.random.normal(k2, (2, 64, 7, 7), dtype=jnp.float32)
    y3 = jax.block_until_ready(global_avg_pool2d(x3))
    assert y3.shape == (2, 64, 1, 1), y3.shape
    assert jnp.allclose(y3, jnp.mean(x3, axis=(2, 3), keepdims=True), atol=1e-5, rtol=1e-5)

    print("KERNEL_OK")
</pallas_src>

<mosaic_0001>
module attributes {stable_mosaic.version = 11 : i64} {
  func.func @_gap_kernel(%arg0: i32, %arg1: i32, %arg2: memref<8x256xf32, #tpu.memory_space<vmem>>, %arg3: memref<256x1xf32, #tpu.memory_space<vmem>>, %arg4: memref<8x1xf32, #tpu.memory_space<vmem>>, %arg5: memref<8x1xf32, #tpu.memory_space<vmem>>) attributes {dimension_semantics = [#tpu.dimension_semantics<parallel>, #tpu.dimension_semantics<arbitrary>], iteration_bounds = array<i64: 1, 1>, scalar_prefetch = 0 : i64, scratch_operands = 1 : i64, tpu.core_type = #tpu.core_type<tc>, window_params = [{transform_indices = @transform_0, window_bounds = array<i64: 8, 256>}, {pipeline_mode = #tpu.pipeline_mode<synchronous>, transform_indices = @transform_1, window_bounds = array<i64: 256, 1>}, {transform_indices = @transform_2, window_bounds = array<i64: 8, 1>}]} {
    %c0_i32 = arith.constant 0 : i32
    %0 = arith.cmpi eq, %arg1, %c0_i32 : i32
    %1 = arith.extui %0 : i1 to i32
    %c0_i32_0 = arith.constant 0 : i32
    %2 = arith.cmpi ne, %1, %c0_i32_0 : i32
    scf.if %2 {
      %cst_10 = arith.constant 0.000000e+00 : f32
      %12 = vector.broadcast %cst_10 : f32 to vector<8x1xf32>
      %c0_11 = arith.constant 0 : index
      %c0_12 = arith.constant 0 : index
      %13 = vector.load %arg5[%c0_11, %c0_12] : memref<8x1xf32, #tpu.memory_space<vmem>>, vector<8x1xf32>
      tpu.vector_store %arg5[%c0_11, %c0_12], %12 {strides = array<i32>} : memref<8x1xf32, #tpu.memory_space<vmem>>, vector<8x1xf32>,
    } else {
    }
    %c0 = arith.constant 0 : index
    %c0_1 = arith.constant 0 : index
    %3 = vector.load %arg2[%c0, %c0_1] : memref<8x256xf32, #tpu.memory_space<vmem>>, vector<8x256xf32>
    %c0_2 = arith.constant 0 : index
    %c0_3 = arith.constant 0 : index
    %4 = vector.load %arg3[%c0_2, %c0_3] : memref<256x1xf32, #tpu.memory_space<vmem>>, vector<256x1xf32>
    %cst = arith.constant dense<0.000000e+00> : vector<8x1xf32>
    %5 = tpu.matmul %3, %4, %cst {dimension_numbers = #tpu.dot_dimension_numbers<[1], [0], [0], [1], [0, 0, 1, 1], [], []>} : vector<8x256xf32>, vector<256x1xf32>, vector<8x1xf32> -> vector<8x1xf32>
    %c0_4 = arith.constant 0 : index
    %c0_5 = arith.constant 0 : index
    %6 = vector.load %arg5[%c0_4, %c0_5] : memref<8x1xf32, #tpu.memory_space<vmem>>, vector<8x1xf32>
    %7 = arith.addf %6, %5 : vector<8x1xf32>
    %c0_6 = arith.constant 0 : index
    %c0_7 = arith.constant 0 : index
    %8 = vector.load %arg5[%c0_6, %c0_7] : memref<8x1xf32, #tpu.memory_space<vmem>>, vector<8x1xf32>
    tpu.vector_store %arg5[%c0_6, %c0_7], %7 {strides = array<i32>} : memref<8x1xf32, #tpu.memory_space<vmem>>, vector<8x1xf32>,
    %c0_i32_8 = arith.constant 0 : i32
    %9 = arith.cmpi eq, %arg1, %c0_i32_8 : i32
    %10 = arith.extui %9 : i1 to i32
    %c0_i32_9 = arith.constant 0 : i32
    %11 = arith.cmpi ne, %10, %c0_i32_9 : i32
    scf.if %11 {
      %c0_10 = arith.constant 0 : index
      %c0_11 = arith.constant 0 : index
      %12 = vector.load %arg5[%c0_10, %c0_11] : memref<8x1xf32, #tpu.memory_space<vmem>>, vector<8x1xf32>
      %cst_12 = arith.constant 3.906250e-03 : f32
      %13 = vector.broadcast %cst_12 : f32 to vector<8x1xf32>
      %14 = arith.mulf %12, %13 : vector<8x1xf32>
      %c0_13 = arith.constant 0 : index
      %c0_14 = arith.constant 0 : index
      %15 = vector.load %arg4[%c0_13, %c0_14] : memref<8x1xf32, #tpu.memory_space<vmem>>, vector<8x1xf32>
      tpu.vector_store %arg4[%c0_13, %c0_14], %14 {strides = array<i32>} : memref<8x1xf32, #tpu.memory_space<vmem>>, vector<8x1xf32>,
    } else {
    }
    return
  }
  func.func @transform_0(%arg0: i32, %arg1: i32) -> (i32, i32) {
    %c0_i32 = arith.constant 0 : i32
    return %arg0, %arg1 : i32, i32
  }
  func.func @transform_1(%arg0: i32, %arg1: i32) -> (i32, i32) {
    %c0_i32 = arith.constant 0 : i32
    %c0_i32_0 = arith.constant 0 : i32
    %c0_i32_1 = arith.constant 0 : i32
    return %c0_i32, %c0_i32_0 : i32, i32
  }
  func.func @transform_2(%arg0: i32, %arg1: i32) -> (i32, i32) {
    %c0_i32 = arith.constant 0 : i32
    %c0_i32_0 = arith.constant 0 : i32
    return %arg0, %c0_i32 : i32, i32
  }
}

</mosaic_0001>

<bundles_post_ra>
// kernel: tpu_custom_call.1
= control target key start
LH: loop header
LB: loop body
LE: loop exit
PB: predicated region body
PF: predicated region fallthrough
CT: control target
= control target key end

     0   :  { %vm15_vm0 = vcmask 7168   ;;  %v106_v34 = vmov 0.0   ;;  %s227_s1 = inlined_call_operand.vmem [shape: f32[256,1], index: 1, kind: input, shape index: {}]   ;;  %s228_s0 = inlined_call_operand.vmem [shape: f32[8,256], index: 0, kind: input, shape index: {}]   ;;  %s229_s2 = inlined_call_operand.vmem [shape: f32[8,1], index: 2, kind: output, shape index: {}]  }
   0x1   :  { %v34_v0 = vld [vmem:[%s227_s1 + $0x78] sm:$0xff]  ;;  %v33_v2 = vld [vmem:[%s227_s1 + $0x70] sm:$0xff]  ;;  %v32_v4 = vld [vmem:[%s227_s1 + $0x68] sm:$0xff]  ;;  %16 = vst.msk [vmem:[#allocation2] sm:$0xff] %vm15_vm0, %v106_v34 }
   0x2   :  { %v50_v1 = vld [vmem:[%s227_s1 + $0xf8] sm:$0xff]  ;;  %51 = vmatpush.msra.mxu0 %v34_v0  ;;  %v49_v3 = vld [vmem:[%s227_s1 + $0xf0] sm:$0xff]  ;;  %v48_v5 = vld [vmem:[%s227_s1 + $0xe8] sm:$0xff] }
   0x3   :  { %71 = vmatpush.msra.mxu1 %v50_v1  ;;  %v31_v6 = vld [vmem:[%s227_s1 + $0x60] sm:$0xff]  ;;  %v30_v8 = vld [vmem:[%s227_s1 + $0x58] sm:$0xff]  ;;  %v29_v10 = vld [vmem:[%s227_s1 + $0x50] sm:$0xff] }
   0x4   :  { %52 = vmatpush.msra.mxu0 %v33_v2  ;;  %v47_v7 = vld [vmem:[%s227_s1 + $0xe0] sm:$0xff]  ;;  %v46_v9 = vld [vmem:[%s227_s1 + $0xd8] sm:$0xff]  ;;  %v45_v11 = vld [vmem:[%s227_s1 + $0xd0] sm:$0xff] }
   0x5   :  { %72 = vmatpush.msra.mxu1 %v49_v3  ;;  %v28_v12 = vld [vmem:[%s227_s1 + $0x48] sm:$0xff]  ;;  %v27_v14 = vld [vmem:[%s227_s1 + $0x40] sm:$0xff]  ;;  %v26_v16 = vld [vmem:[%s227_s1 + $0x38] sm:$0xff] }
   0x6   :  { %53 = vmatpush.msra.mxu0 %v32_v4  ;;  %v44_v13 = vld [vmem:[%s227_s1 + $0xc8] sm:$0xff]  ;;  %v43_v15 = vld [vmem:[%s227_s1 + $0xc0] sm:$0xff]  ;;  %v42_v17 = vld [vmem:[%s227_s1 + $0xb8] sm:$0xff] }
   0x7   :  { %73 = vmatpush.msra.mxu1 %v48_v5  ;;  %v25_v18 = vld [vmem:[%s227_s1 + $0x30] sm:$0xff]  ;;  %v24_v20 = vld [vmem:[%s227_s1 + $0x28] sm:$0xff]  ;;  %v23_v22 = vld [vmem:[%s227_s1 + $0x20] sm:$0xff] }
   0x8   :  { %54 = vmatpush.msra.mxu0 %v31_v6  ;;  %v41_v19 = vld [vmem:[%s227_s1 + $0xb0] sm:$0xff]  ;;  %v40_v21 = vld [vmem:[%s227_s1 + $0xa8] sm:$0xff]  ;;  %v39_v23 = vld [vmem:[%s227_s1 + $0xa0] sm:$0xff] }
   0x9   :  { %74 = vmatpush.msra.mxu1 %v47_v7  ;;  %v22_v24 = vld [vmem:[%s227_s1 + $0x18] sm:$0xff]  ;;  %v21_v26 = vld [vmem:[%s227_s1 + $0x10] sm:$0xff]  ;;  %v20_v28 = vld [vmem:[%s227_s1 + $0x8] sm:$0xff] }
   0xa   :  { %55 = vmatpush.msra.mxu0 %v30_v8  ;;  %v38_v25 = vld [vmem:[%s227_s1 + $0x98] sm:$0xff]  ;;  %v37_v27 = vld [vmem:[%s227_s1 + $0x90] sm:$0xff]  ;;  %v36_v29 = vld [vmem:[%s227_s1 + $0x88] sm:$0xff] }
   0xb   :  { %75 = vmatpush.msra.mxu1 %v46_v9  ;;  %v19_v30 = vld [vmem:[%s227_s1] sm:$0xff]  ;;  %v18_v33 = vld [vmem:[%s228_s0 + $0x8] sm:$0xff] }
   0xc   :  { %56 = vmatpush.msra.mxu0 %v29_v10  ;;  %v35_v31 = vld [vmem:[%s227_s1 + $0x80] sm:$0xff] }
   0xd   :  { %76 = vmatpush.msra.mxu1 %v45_v11  ;;  %v17_v32 = vld [vmem:[%s228_s0] sm:$0xff] }
   0xe   :  { %57 = vmatpush.msra.mxu0 %v28_v12  ;;  %v91_v37 = vld [vmem:[#allocation2] sm:$0xff] }
   0xf   :  { %77 = vmatpush.msra.mxu1 %v44_v13 }
  0x10   :  { %58 = vmatpush.msra.mxu0 %v27_v14 }
  0x11   :  { %78 = vmatpush.msra.mxu1 %v43_v15 }
  0x12   :  { %59 = vmatpush.msra.mxu0 %v26_v16 }
  0x13   :  { %79 = vmatpush.msra.mxu1 %v42_v17 }
  0x14   :  { %60 = vmatpush.msra.mxu0 %v25_v18 }
  0x15   :  { %80 = vmatpush.msra.mxu1 %v41_v19 }
  0x16   :  { %61 = vmatpush.msra.mxu0 %v24_v20 }
  0x17   :  { %81 = vmatpush.msra.mxu1 %v40_v21 }
  0x18   :  { %62 = vmatpush.msra.mxu0 %v23_v22 }
  0x19   :  { %82 = vmatpush.msra.mxu1 %v39_v23 }
  0x1a   :  { %63 = vmatpush.msra.mxu0 %v22_v24 }
  0x1b   :  { %83 = vmatpush.msra.mxu1 %v38_v25 }
  0x1c   :  { %64 = vmatpush.msra.mxu0 %v21_v26 }
  0x1d   :  { %84 = vmatpush.msra.mxu1 %v37_v27 }
  0x1e   :  { %65 = vmatpush.msra.mxu0 %v20_v28 }
  0x1f   :  { %85 = vmatpush.msra.mxu1 %v36_v29 }
  0x20   :  { %66 = vmatpush.msra.mxu0 %v19_v30 }
  0x21   :  { %86 = vmatpush.msra.mxu1 %v35_v31  ;;  %67 = vmatmul.f32.vlgmr.msra.gmra.mxu0 %v17_v32 }
  0x22   :  { %87 = vmatmul.f32.vlgmr.msra.gmra.mxu1 %v18_v33 }
  0x9e   :  { %v68_v35 = vpop.f32.mrf.mxu0 }
  0x9f   :  { %v88_v36 = vpop.f32.mrf.mxu1 }
  0xa0   :  { %v89_v38 = vadd.f32 %v88_v36, %v68_v35 }
  0xa2   :  { %v92_v39 = vadd.f32 %v91_v37, %v89_v38 }
  0xa4   :  { %94 = vst.msk [vmem:[#allocation2] sm:$0xff] %vm15_vm0, %v92_v39 }
  0xab   :  { %v98_v40 = vld [vmem:[#allocation2] sm:$0xff] }
  0xac   :  { %v99_v41 = vmul.f32 0.00390625, %v98_v40 }
  0xae   :  { %100 = vst.msk [vmem:[%s229_s2] sm:$0xff] %vm15_vm0, %v99_v41 }

</bundles_post_ra>
